<compile_context>
chip_gen: v7x
topology: tpu7x:2x2x1
jax: 0.10.0
libtpu: 0.0.40
codegen_flags: <defaults>
</compile_context>

<pallas_src>
import jax
import jax.numpy as jnp
from jax.experimental import pallas as pl
from jax.experimental.pallas import tpu as pltpu


def _sigmoid_via_tanh(x):
    # sigmoid(x) == 0.5 * tanh(0.5 * x) + 0.5 : single EUP pass + cheap VPU ops.
    return 0.5 * jnp.tanh(0.5 * x) + 0.5


def _make_lstm_kernel(T, TC, H, unroll):
    """Builds the recurrent kernel for static (T, TC, H)."""
    needs_mask = (T % TC) != 0  # only emit tail masking when actually needed

    def kernel(x_ref, wih_ref, whh_ref, b_ref, wout_ref, bout_ref,
               out_ref, h_sc, c_sc):
        chunk = pl.program_id(1)

        @pl.when(chunk == 0)
        def _():
            h_sc[...] = jnp.zeros_like(h_sc)
            c_sc[...] = jnp.zeros_like(c_sc)

        # Loop-invariant loads hoisted out of the recurrence (once per chunk).
        wih = wih_ref[...]            # (I, 4H)  matmul dtype (bf16 by default)
        whh = whh_ref[...]            # (H, 4H)  matmul dtype
        b_row = b_ref[...]            # (1, 4H)  f32
        dt = whh.dtype
        t0 = chunk * TC

        def step(i, carry):
            h, c = carry                                   # vreg-resident f32
            # Input projection: independent of h -> off the serial chain; the
            # unrolled-loop scheduler overlaps it with the previous step.
            xg = jnp.dot(x_ref[i].astype(dt), wih,
                         preferred_element_type=jnp.float32)
            gates = (jnp.dot(h.astype(dt), whh,
                             preferred_element_type=jnp.float32)
                     + xg + b_row)                         # (BB, 4H) f32
            # gate order [i, f, o, g]: contiguous sigmoid slice + tanh tail
            sig = _sigmoid_via_tanh(gates[:, : 3 * H])
            g_g = jnp.tanh(gates[:, 3 * H:])
            i_g = sig[:, :H]
            f_g = sig[:, H: 2 * H]
            o_g = sig[:, 2 * H: 3 * H]

            c_new = f_g * c + i_g * g_g
            h_new = o_g * jnp.tanh(c_new)

            if needs_mask:  # padded tail timesteps when T is not a multiple of TC
                valid = (t0 + i) < T
                c_new = jnp.where(valid, c_new, c)
                h_new = jnp.where(valid, h_new, h)
            return h_new, c_new

        # h / c stay in vregs through the loop; scratch is touched only twice
        # per chunk (carry state across grid steps).
        h_fin, c_fin = jax.lax.fori_loop(
            0, TC, step, (h_sc[...], c_sc[...]), unroll=unroll)
        h_sc[...] = h_fin
        c_sc[...] = c_fin

        @pl.when(chunk == pl.num_programs(1) - 1)
        def _():
            out_ref[...] = (
                jnp.dot(h_fin, wout_ref[...],
                        preferred_element_type=jnp.float32)
                + bout_ref[...]
            ).astype(out_ref.dtype)

    return kernel


def init_torch_params(key, input_size, hidden=64, out_dim=2):
    """PyTorch-layout params: uniform(-1/sqrt(H), 1/sqrt(H)), gate order [i,f,g,o]."""
    k = 1.0 / jnp.sqrt(jnp.float32(hidden))
    keys = jax.random.split(key, 6)
    w_ih = jax.random.uniform(keys[0], (4 * hidden, input_size), jnp.float32, -k, k)
    w_hh = jax.random.uniform(keys[1], (4 * hidden, hidden), jnp.float32, -k, k)
    b_ih = jax.random.uniform(keys[2], (4 * hidden,), jnp.float32, -k, k)
    b_hh = jax.random.uniform(keys[3], (4 * hidden,), jnp.float32, -k, k)
    w_out = jax.random.uniform(keys[4], (out_dim, hidden), jnp.float32, -k, k)
    b_out = jax.random.uniform(keys[5], (out_dim,), jnp.float32, -k, k)
    return w_ih, w_hh, b_ih, b_hh, w_out, b_out


def pack_params(torch_params, *, matmul_dtype=jnp.bfloat16):
    """Transpose + reorder gate columns [i,f,g,o] -> [i,f,o,g] for the kernel."""
    w_ih, w_hh, b_ih, b_hh, w_out, b_out = torch_params
    H = w_hh.shape[1]
    perm = jnp.concatenate([jnp.arange(0, 2 * H),        # i, f
                            jnp.arange(3 * H, 4 * H),    # o
                            jnp.arange(2 * H, 3 * H)])   # g
    wih_t = w_ih.T[:, perm].astype(matmul_dtype)          # (I, 4H)
    whh_t = w_hh.T[:, perm].astype(matmul_dtype)          # (H, 4H)
    b = (b_ih + b_hh)[perm][None, :].astype(jnp.float32)  # (1, 4H)
    wout_t = w_out.T.astype(jnp.float32)                  # (H, 2)
    bout = b_out[None, :].astype(jnp.float32)             # (1, 2)
    return wih_t, whh_t, b, wout_t, bout


def rnn_forward(x_btI, torch_params, *, time_block=128, batch_block=None,
                unroll=8, matmul_dtype=jnp.bfloat16):
    """x_btI: (B, T, I) float32, PyTorch batch_first layout. Returns (B, 2)."""
    wih_t, whh_t, b, wout_t, bout = pack_params(torch_params,
                                                matmul_dtype=matmul_dtype)
    B, T, I = x_btI.shape
    H = whh_t.shape[0]
    if T == 0:
        raise ValueError("sequence length must be > 0")

    # Time blocking: TC timesteps per grid step.  Each grid step has ~0.35 us
    # fixed overhead while the per-chunk x DMA is only TC*B*I*4 bytes, so
    # large chunks amortize it (keep sizes against VMEM when scaling TC / B).
    TC = min(time_block, T)
    n_chunks = pl.cdiv(T, TC)
    T_pad = n_chunks * TC

    # Optional batch blocking: on v7x the "parallel" leading grid axis lets the
    # second TensorCore run half the batch's recurrence.  Blocks other than a
    # single full-batch block must be 8-row (sublane) aligned.
    if batch_block is None or batch_block >= B:
        BB, n_bb, B_pad = B, 1, B
    else:
        BB = max(8, (batch_block // 8) * 8)
        n_bb = pl.cdiv(B, BB)
        B_pad = n_bb * BB

    x = jnp.transpose(x_btI, (1, 0, 2)).astype(jnp.float32)   # (T, B, I)
    if T_pad != T or B_pad != B:
        x = jnp.pad(x, ((0, T_pad - T), (0, B_pad - B), (0, 0)))

    kernel = _make_lstm_kernel(T=T, TC=TC, H=H, unroll=min(unroll, TC))

    out = pl.pallas_call(
        kernel,
        out_shape=jax.ShapeDtypeStruct((B_pad, 2), jnp.float32),
        grid_spec=pltpu.PrefetchScalarGridSpec(
            num_scalar_prefetch=0,
            grid=(n_bb, n_chunks),            # (batch blocks, time chunks)
            in_specs=[
                # raw input chunk (double-buffered by default)
                pl.BlockSpec((TC, BB, I), lambda bb, c: (c, bb, 0)),
                # grid-invariant operands: single-buffered
                pl.BlockSpec((I, 4 * H), lambda bb, c: (0, 0),
                             pipeline_mode=pl.Buffered(1)),      # W_ih^T
                pl.BlockSpec((H, 4 * H), lambda bb, c: (0, 0),
                             pipeline_mode=pl.Buffered(1)),      # W_hh^T
                pl.BlockSpec((1, 4 * H), lambda bb, c: (0, 0),
                             pipeline_mode=pl.Buffered(1)),      # bias
                pl.BlockSpec((H, 2), lambda bb, c: (0, 0),
                             pipeline_mode=pl.Buffered(1)),      # W_out^T
                pl.BlockSpec((1, 2), lambda bb, c: (0, 0),
                             pipeline_mode=pl.Buffered(1)),      # b_out
            ],
            out_specs=pl.BlockSpec((BB, 2), lambda bb, c: (bb, 0)),
            scratch_shapes=[
                pltpu.VMEM((BB, H), jnp.float32),   # h (carried across chunks)
                pltpu.VMEM((BB, H), jnp.float32),   # c
            ],
        ),
        compiler_params=pltpu.CompilerParams(
            # batch blocks are independent; the time axis carries (h, c)
            dimension_semantics=("parallel", "arbitrary"),
        ),
    )(x, wih_t, whh_t, b, wout_t, bout)
    return out[:B]


def rnn_reference(x_btI, torch_params):
    """Pure-JAX reference with PyTorch semantics (gate order [i,f,g,o], f32)."""
    w_ih, w_hh, b_ih, b_hh, w_out, b_out = torch_params
    H = w_hh.shape[1]
    B, T, I = x_btI.shape
    h = jnp.zeros((B, H), jnp.float32)
    c = jnp.zeros((B, H), jnp.float32)

    def step(carry, x_t):
        h, c = carry
        gates = x_t @ w_ih.T + h @ w_hh.T + b_ih + b_hh
        i = jax.nn.sigmoid(gates[:, 0 * H:1 * H])
        f = jax.nn.sigmoid(gates[:, 1 * H:2 * H])
        g = jnp.tanh(gates[:, 2 * H:3 * H])
        o = jax.nn.sigmoid(gates[:, 3 * H:4 * H])
        c = f * c + i * g
        h = o * jnp.tanh(c)
        return (h, c), None

    (h, c), _ = jax.lax.scan(step, (h, c), jnp.transpose(x_btI, (1, 0, 2)))
    return h @ w_out.T + b_out


if __name__ == "__main__":
    B, T, I = 2, 8, 32   # batch, seq_len, input_size (hidden=64 per the module)
    key = jax.random.PRNGKey(0)
    kx, kp = jax.random.split(key)
    x = jax.random.normal(kx, (B, T, I), jnp.float32)
    params = init_torch_params(kp, input_size=I)

    ref = rnn_reference(x, params)

    # f32-matmul path: tight check against the PyTorch-semantics reference.
    out_f32 = jax.block_until_ready(
        rnn_forward(x, params, matmul_dtype=jnp.float32))
    assert out_f32.shape == (B, 2)
    assert jnp.allclose(out_f32, ref, atol=1e-4, rtol=1e-4), (
        f"f32 path max abs err {jnp.max(jnp.abs(out_f32 - ref))}")

    # Default bf16-matmul path (f32 accumulation, f32 state): looser tolerance
    # per the bf16-cast recommendation.
    out = jax.block_until_ready(rnn_forward(x, params))
    assert out.shape == (B, 2)
    assert jnp.allclose(out, ref, atol=3e-2, rtol=3e-2), (
        f"bf16 path max abs err {jnp.max(jnp.abs(out - ref))}")

    print("KERNEL_OK")
</pallas_src>

<mosaic_0001>
module attributes {stable_mosaic.version = 11 : i64} {
  func.func @kernel(%arg0: i32, %arg1: i32, %arg2: memref<8x2x32xf32, #tpu.memory_space<vmem>>, %arg3: memref<32x256xf32, #tpu.memory_space<vmem>>, %arg4: memref<64x256xf32, #tpu.memory_space<vmem>>, %arg5: memref<1x256xf32, #tpu.memory_space<vmem>>, %arg6: memref<64x2xf32, #tpu.memory_space<vmem>>, %arg7: memref<1x2xf32, #tpu.memory_space<vmem>>, %arg8: memref<2x2xf32, #tpu.memory_space<vmem>>, %arg9: memref<2x64xf32, #tpu.memory_space<vmem>>, %arg10: memref<2x64xf32, #tpu.memory_space<vmem>>) attributes {dimension_semantics = [#tpu.dimension_semantics<parallel>, #tpu.dimension_semantics<arbitrary>], iteration_bounds = array<i64: 1, 1>, scalar_prefetch = 0 : i64, scratch_operands = 2 : i64, tpu.core_type = #tpu.core_type<tc>, window_params = [{transform_indices = @transform_0, window_bounds = array<i64: 8, 2, 32>}, {pipeline_mode = #tpu.pipeline_mode<synchronous>, transform_indices = @transform_1, window_bounds = array<i64: 32, 256>}, {pipeline_mode = #tpu.pipeline_mode<synchronous>, transform_indices = @transform_2, window_bounds = array<i64: 64, 256>}, {pipeline_mode = #tpu.pipeline_mode<synchronous>, transform_indices = @transform_3, window_bounds = array<i64: 1, 256>}, {pipeline_mode = #tpu.pipeline_mode<synchronous>, transform_indices = @transform_4, window_bounds = array<i64: 64, 2>}, {pipeline_mode = #tpu.pipeline_mode<synchronous>, transform_indices = @transform_5, window_bounds = array<i64: 1, 2>}, {transform_indices = @transform_6, window_bounds = array<i64: 2, 2>}]} {
    %c0_i32 = arith.constant 0 : i32
    %0 = arith.cmpi eq, %arg1, %c0_i32 : i32
    %1 = arith.extui %0 : i1 to i32
    %c0_i32_0 = arith.constant 0 : i32
    %2 = arith.cmpi ne, %1, %c0_i32_0 : i32
    scf.if %2 {
      %cst_72 = arith.constant 0.000000e+00 : f32
      %221 = vector.broadcast %cst_72 : f32 to vector<2x64xf32>
      %c0_73 = arith.constant 0 : index
      %c0_74 = arith.constant 0 : index
      %222 = vector.load %arg9[%c0_73, %c0_74] : memref<2x64xf32, #tpu.memory_space<vmem>>, vector<2x64xf32>
      tpu.vector_store %arg9[%c0_73, %c0_74], %221 {strides = array<i32>} : memref<2x64xf32, #tpu.memory_space<vmem>>, vector<2x64xf32>,
      %cst_75 = arith.constant 0.000000e+00 : f32
      %223 = vector.broadcast %cst_75 : f32 to vector<2x64xf32>
      %c0_76 = arith.constant 0 : index
      %c0_77 = arith.constant 0 : index
      %224 = vector.load %arg10[%c0_76, %c0_77] : memref<2x64xf32, #tpu.memory_space<vmem>>, vector<2x64xf32>
      tpu.vector_store %arg10[%c0_76, %c0_77], %223 {strides = array<i32>} : memref<2x64xf32, #tpu.memory_space<vmem>>, vector<2x64xf32>,
    } else {
    }
    %c0 = arith.constant 0 : index
    %c0_1 = arith.constant 0 : index
    %3 = vector.load %arg3[%c0, %c0_1] : memref<32x256xf32, #tpu.memory_space<vmem>>, vector<32x256xf32>
    %c0_2 = arith.constant 0 : index
    %c0_3 = arith.constant 0 : index
    %4 = vector.load %arg4[%c0_2, %c0_3] : memref<64x256xf32, #tpu.memory_space<vmem>>, vector<64x256xf32>
    %c0_4 = arith.constant 0 : index
    %c0_5 = arith.constant 0 : index
    %5 = vector.load %arg5[%c0_4, %c0_5] : memref<1x256xf32, #tpu.memory_space<vmem>>, vector<1x256xf32>
    %c0_6 = arith.constant 0 : index
    %c0_7 = arith.constant 0 : index
    %6 = vector.load %arg9[%c0_6, %c0_7] : memref<2x64xf32, #tpu.memory_space<vmem>>, vector<2x64xf32>
    %c0_8 = arith.constant 0 : index
    %c0_9 = arith.constant 0 : index
    %7 = vector.load %arg10[%c0_8, %c0_9] : memref<2x64xf32, #tpu.memory_space<vmem>>, vector<2x64xf32>
    %c0_i32_10 = arith.constant 0 : i32
    %8 = arith.index_cast %c0_i32_10 : i32 to index
    %c0_11 = arith.constant 0 : index
    %c0_12 = arith.constant 0 : index
    %9 = vector.load %arg2[%8, %c0_11, %c0_12] : memref<8x2x32xf32, #tpu.memory_space<vmem>>, vector<1x2x32xf32>
    %10 = vector.shape_cast %9 : vector<1x2x32xf32> to vector<2x32xf32>
    %cst = arith.constant dense<0.000000e+00> : vector<2x256xf32>
    %11 = tpu.matmul %10, %3, %cst {dimension_numbers = #tpu.dot_dimension_numbers<[1], [0], [0], [1], [0, 0, 1, 1], [], []>} : vector<2x32xf32>, vector<32x256xf32>, vector<2x256xf32> -> vector<2x256xf32>
    %cst_13 = arith.constant dense<0.000000e+00> : vector<2x256xf32>
    %12 = tpu.matmul %6, %4, %cst_13 {dimension_numbers = #tpu.dot_dimension_numbers<[1], [0], [0], [1], [0, 0, 1, 1], [], []>} : vector<2x64xf32>, vector<64x256xf32>, vector<2x256xf32> -> vector<2x256xf32>
    %13 = arith.addf %12, %11 : vector<2x256xf32>
    %14 = vector.broadcast %5 : vector<1x256xf32> to vector<2x256xf32>
    %15 = arith.addf %13, %14 : vector<2x256xf32>
    %16 = vector.extract_strided_slice %15 {offsets = [0, 0], sizes = [2, 192], strides = [1, 1]} : vector<2x256xf32> to vector<2x192xf32>
    %cst_14 = arith.constant 5.000000e-01 : f32
    %17 = vector.broadcast %cst_14 : f32 to vector<2x192xf32>
    %18 = arith.mulf %17, %16 : vector<2x192xf32>
    %19 = math.tanh %18 : vector<2x192xf32>
    %cst_15 = arith.constant 5.000000e-01 : f32
    %20 = vector.broadcast %cst_15 : f32 to vector<2x192xf32>
    %21 = arith.mulf %20, %19 : vector<2x192xf32>
    %cst_16 = arith.constant 5.000000e-01 : f32
    %22 = vector.broadcast %cst_16 : f32 to vector<2x192xf32>
    %23 = arith.addf %21, %22 : vector<2x192xf32>
    %24 = vector.extract_strided_slice %15 {offsets = [0, 192], sizes = [2, 64], strides = [1, 1]} : vector<2x256xf32> to vector<2x64xf32>
    %25 = math.tanh %24 : vector<2x64xf32>
    %26 = vector.extract_strided_slice %23 {offsets = [0, 0], sizes = [2, 64], strides = [1, 1]} : vector<2x192xf32> to vector<2x64xf32>
    %27 = vector.extract_strided_slice %23 {offsets = [0, 64], sizes = [2, 64], strides = [1, 1]} : vector<2x192xf32> to vector<2x64xf32>
    %28 = vector.extract_strided_slice %23 {offsets = [0, 128], sizes = [2, 64], strides = [1, 1]} : vector<2x192xf32> to vector<2x64xf32>
    %29 = arith.mulf %27, %7 : vector<2x64xf32>
    %30 = arith.mulf %26, %25 : vector<2x64xf32>
    %31 = arith.addf %29, %30 : vector<2x64xf32>
    %32 = math.tanh %31 : vector<2x64xf32>
    %33 = arith.mulf %28, %32 : vector<2x64xf32>
    %c1_i32 = arith.constant 1 : i32
    %34 = arith.index_cast %c1_i32 : i32 to index
    %c0_17 = arith.constant 0 : index
    %c0_18 = arith.constant 0 : index
    %35 = vector.load %arg2[%34, %c0_17, %c0_18] : memref<8x2x32xf32, #tpu.memory_space<vmem>>, vector<1x2x32xf32>
    %36 = vector.shape_cast %35 : vector<1x2x32xf32> to vector<2x32xf32>
    %cst_19 = arith.constant dense<0.000000e+00> : vector<2x256xf32>
    %37 = tpu.matmul %36, %3, %cst_19 {dimension_numbers = #tpu.dot_dimension_numbers<[1], [0], [0], [1], [0, 0, 1, 1], [], []>} : vector<2x32xf32>, vector<32x256xf32>, vector<2x256xf32> -> vector<2x256xf32>
    %cst_20 = arith.constant dense<0.000000e+00> : vector<2x256xf32>
    %38 = tpu.matmul %33, %4, %cst_20 {dimension_numbers = #tpu.dot_dimension_numbers<[1], [0], [0], [1], [0, 0, 1, 1], [], []>} : vector<2x64xf32>, vector<64x256xf32>, vector<2x256xf32> -> vector<2x256xf32>
    %39 = arith.addf %38, %37 : vector<2x256xf32>
    %40 = vector.broadcast %5 : vector<1x256xf32> to vector<2x256xf32>
    %41 = arith.addf %39, %40 : vector<2x256xf32>
    %42 = vector.extract_strided_slice %41 {offsets = [0, 0], sizes = [2, 192], strides = [1, 1]} : vector<2x256xf32> to vector<2x192xf32>
    %cst_21 = arith.constant 5.000000e-01 : f32
    %43 = vector.broadcast %cst_21 : f32 to vector<2x192xf32>
    %44 = arith.mulf %43, %42 : vector<2x192xf32>
    %45 = math.tanh %44 : vector<2x192xf32>
    %cst_22 = arith.constant 5.000000e-01 : f32
    %46 = vector.broadcast %cst_22 : f32 to vector<2x192xf32>
    %47 = arith.mulf %46, %45 : vector<2x192xf32>
    %cst_23 = arith.constant 5.000000e-01 : f32
    %48 = vector.broadcast %cst_23 : f32 to vector<2x192xf32>
    %49 = arith.addf %47, %48 : vector<2x192xf32>
    %50 = vector.extract_strided_slice %41 {offsets = [0, 192], sizes = [2, 64], strides = [1, 1]} : vector<2x256xf32> to vector<2x64xf32>
    %51 = math.tanh %50 : vector<2x64xf32>
    %52 = vector.extract_strided_slice %49 {offsets = [0, 0], sizes = [2, 64], strides = [1, 1]} : vector<2x192xf32> to vector<2x64xf32>
    %53 = vector.extract_strided_slice %49 {offsets = [0, 64], sizes = [2, 64], strides = [1, 1]} : vector<2x192xf32> to vector<2x64xf32>
    %54 = vector.extract_strided_slice %49 {offsets = [0, 128], sizes = [2, 64], strides = [1, 1]} : vector<2x192xf32> to vector<2x64xf32>
    %55 = arith.mulf %53, %31 : vector<2x64xf32>
    %56 = arith.mulf %52, %51 : vector<2x64xf32>
    %57 = arith.addf %55, %56 : vector<2x64xf32>
    %58 = math.tanh %57 : vector<2x64xf32>
    %59 = arith.mulf %54, %58 : vector<2x64xf32>
    %c2_i32 = arith.constant 2 : i32
    %60 = arith.index_cast %c2_i32 : i32 to index
    %c0_24 = arith.constant 0 : index
    %c0_25 = arith.constant 0 : index
    %61 = vector.load %arg2[%60, %c0_24, %c0_25] : memref<8x2x32xf32, #tpu.memory_space<vmem>>, vector<1x2x32xf32>
    %62 = vector.shape_cast %61 : vector<1x2x32xf32> to vector<2x32xf32>
    %cst_26 = arith.constant dense<0.000000e+00> : vector<2x256xf32>
    %63 = tpu.matmul %62, %3, %cst_26 {dimension_numbers = #tpu.dot_dimension_numbers<[1], [0], [0], [1], [0, 0, 1, 1], [], []>} : vector<2x32xf32>, vector<32x256xf32>, vector<2x256xf32> -> vector<2x256xf32>
    %cst_27 = arith.constant dense<0.000000e+00> : vector<2x256xf32>
    %64 = tpu.matmul %59, %4, %cst_27 {dimension_numbers = #tpu.dot_dimension_numbers<[1], [0], [0], [1], [0, 0, 1, 1], [], []>} : vector<2x64xf32>, vector<64x256xf32>, vector<2x256xf32> -> vector<2x256xf32>
    %65 = arith.addf %64, %63 : vector<2x256xf32>
    %66 = vector.broadcast %5 : vector<1x256xf32> to vector<2x256xf32>
    %67 = arith.addf %65, %66 : vector<2x256xf32>
    %68 = vector.extract_strided_slice %67 {offsets = [0, 0], sizes = [2, 192], strides = [1, 1]} : vector<2x256xf32> to vector<2x192xf32>
    %cst_28 = arith.constant 5.000000e-01 : f32
    %69 = vector.broadcast %cst_28 : f32 to vector<2x192xf32>
    %70 = arith.mulf %69, %68 : vector<2x192xf32>
    %71 = math.tanh %70 : vector<2x192xf32>
    %cst_29 = arith.constant 5.000000e-01 : f32
    %72 = vector.broadcast %cst_29 : f32 to vector<2x192xf32>
    %73 = arith.mulf %72, %71 : vector<2x192xf32>
    %cst_30 = arith.constant 5.000000e-01 : f32
    %74 = vector.broadcast %cst_30 : f32 to vector<2x192xf32>
    %75 = arith.addf %73, %74 : vector<2x192xf32>
    %76 = vector.extract_strided_slice %67 {offsets = [0, 192], sizes = [2, 64], strides = [1, 1]} : vector<2x256xf32> to vector<2x64xf32>
    %77 = math.tanh %76 : vector<2x64xf32>
    %78 = vector.extract_strided_slice %75 {offsets = [0, 0], sizes = [2, 64], strides = [1, 1]} : vector<2x192xf32> to vector<2x64xf32>
    %79 = vector.extract_strided_slice %75 {offsets = [0, 64], sizes = [2, 64], strides = [1, 1]} : vector<2x192xf32> to vector<2x64xf32>
    %80 = vector.extract_strided_slice %75 {offsets = [0, 128], sizes = [2, 64], strides = [1, 1]} : vector<2x192xf32> to vector<2x64xf32>
    %81 = arith.mulf %79, %57 : vector<2x64xf32>
    %82 = arith.mulf %78, %77 : vector<2x64xf32>
    %83 = arith.addf %81, %82 : vector<2x64xf32>
    %84 = math.tanh %83 : vector<2x64xf32>
    %85 = arith.mulf %80, %84 : vector<2x64xf32>
    %c3_i32 = arith.constant 3 : i32
    %86 = arith.index_cast %c3_i32 : i32 to index
    %c0_31 = arith.constant 0 : index
    %c0_32 = arith.constant 0 : index
    %87 = vector.load %arg2[%86, %c0_31, %c0_32] : memref<8x2x32xf32, #tpu.memory_space<vmem>>, vector<1x2x32xf32>
    %88 = vector.shape_cast %87 : vector<1x2x32xf32> to vector<2x32xf32>
    %cst_33 = arith.constant dense<0.000000e+00> : vector<2x256xf32>
    %89 = tpu.matmul %88, %3, %cst_33 {dimension_numbers = #tpu.dot_dimension_numbers<[1], [0], [0], [1], [0, 0, 1, 1], [], []>} : vector<2x32xf32>, vector<32x256xf32>, vector<2x256xf32> -> vector<2x256xf32>
    %cst_34 = arith.constant dense<0.000000e+00> : vector<2x256xf32>
    %90 = tpu.matmul %85, %4, %cst_34 {dimension_numbers = #tpu.dot_dimension_numbers<[1], [0], [0], [1], [0, 0, 1, 1], [], []>} : vector<2x64xf32>, vector<64x256xf32>, vector<2x256xf32> -> vector<2x256xf32>
    %91 = arith.addf %90, %89 : vector<2x256xf32>
    %92 = vector.broadcast %5 : vector<1x256xf32> to vector<2x256xf32>
    %93 = arith.addf %91, %92 : vector<2x256xf32>
    %94 = vector.extract_strided_slice %93 {offsets = [0, 0], sizes = [2, 192], strides = [1, 1]} : vector<2x256xf32> to vector<2x192xf32>
    %cst_35 = arith.constant 5.000000e-01 : f32
    %95 = vector.broadcast %cst_35 : f32 to vector<2x192xf32>
    %96 = arith.mulf %95, %94 : vector<2x192xf32>
    %97 = math.tanh %96 : vector<2x192xf32>
    %cst_36 = arith.constant 5.000000e-01 : f32
    %98 = vector.broadcast %cst_36 : f32 to vector<2x192xf32>
    %99 = arith.mulf %98, %97 : vector<2x192xf32>
    %cst_37 = arith.constant 5.000000e-01 : f32
    %100 = vector.broadcast %cst_37 : f32 to vector<2x192xf32>
    %101 = arith.addf %99, %100 : vector<2x192xf32>
    %102 = vector.extract_strided_slice %93 {offsets = [0, 192], sizes = [2, 64], strides = [1, 1]} : vector<2x256xf32> to vector<2x64xf32>
    %103 = math.tanh %102 : vector<2x64xf32>
    %104 = vector.extract_strided_slice %101 {offsets = [0, 0], sizes = [2, 64], strides = [1, 1]} : vector<2x192xf32> to vector<2x64xf32>
    %105 = vector.extract_strided_slice %101 {offsets = [0, 64], sizes = [2, 64], strides = [1, 1]} : vector<2x192xf32> to vector<2x64xf32>
    %106 = vector.extract_strided_slice %101 {offsets = [0, 128], sizes = [2, 64], strides = [1, 1]} : vector<2x192xf32> to vector<2x64xf32>
    %107 = arith.mulf %105, %83 : vector<2x64xf32>
    %108 = arith.mulf %104, %103 : vector<2x64xf32>
    %109 = arith.addf %107, %108 : vector<2x64xf32>
    %110 = math.tanh %109 : vector<2x64xf32>
    %111 = arith.mulf %106, %110 : vector<2x64xf32>
    %c4_i32 = arith.constant 4 : i32
    %112 = arith.index_cast %c4_i32 : i32 to index
    %c0_38 = arith.constant 0 : index
    %c0_39 = arith.constant 0 : index
    %113 = vector.load %arg2[%112, %c0_38, %c0_39] : memref<8x2x32xf32, #tpu.memory_space<vmem>>, vector<1x2x32xf32>
    %114 = vector.shape_cast %113 : vector<1x2x32xf32> to vector<2x32xf32>
    %cst_40 = arith.constant dense<0.000000e+00> : vector<2x256xf32>
    %115 = tpu.matmul %114, %3, %cst_40 {dimension_numbers = #tpu.dot_dimension_numbers<[1], [0], [0], [1], [0, 0, 1, 1], [], []>} : vector<2x32xf32>, vector<32x256xf32>, vector<2x256xf32> -> vector<2x256xf32>
    %cst_41 = arith.constant dense<0.000000e+00> : vector<2x256xf32>
    %116 = tpu.matmul %111, %4, %cst_41 {dimension_numbers = #tpu.dot_dimension_numbers<[1], [0], [0], [1], [0, 0, 1, 1], [], []>} : vector<2x64xf32>, vector<64x256xf32>, vector<2x256xf32> -> vector<2x256xf32>
    %117 = arith.addf %116, %115 : vector<2x256xf32>
    %118 = vector.broadcast %5 : vector<1x256xf32> to vector<2x256xf32>
    %119 = arith.addf %117, %118 : vector<2x256xf32>
    %120 = vector.extract_strided_slice %119 {offsets = [0, 0], sizes = [2, 192], strides = [1, 1]} : vector<2x256xf32> to vector<2x192xf32>
    %cst_42 = arith.constant 5.000000e-01 : f32
    %121 = vector.broadcast %cst_42 : f32 to vector<2x192xf32>
    %122 = arith.mulf %121, %120 : vector<2x192xf32>
    %123 = math.tanh %122 : vector<2x192xf32>
    %cst_43 = arith.constant 5.000000e-01 : f32
    %124 = vector.broadcast %cst_43 : f32 to vector<2x192xf32>
    %125 = arith.mulf %124, %123 : vector<2x192xf32>
    %cst_44 = arith.constant 5.000000e-01 : f32
    %126 = vector.broadcast %cst_44 : f32 to vector<2x192xf32>
    %127 = arith.addf %125, %126 : vector<2x192xf32>
    %128 = vector.extract_strided_slice %119 {offsets = [0, 192], sizes = [2, 64], strides = [1, 1]} : vector<2x256xf32> to vector<2x64xf32>
    %129 = math.tanh %128 : vector<2x64xf32>
    %130 = vector.extract_strided_slice %127 {offsets = [0, 0], sizes = [2, 64], strides = [1, 1]} : vector<2x192xf32> to vector<2x64xf32>
    %131 = vector.extract_strided_slice %127 {offsets = [0, 64], sizes = [2, 64], strides = [1, 1]} : vector<2x192xf32> to vector<2x64xf32>
    %132 = vector.extract_strided_slice %127 {offsets = [0, 128], sizes = [2, 64], strides = [1, 1]} : vector<2x192xf32> to vector<2x64xf32>
    %133 = arith.mulf %131, %109 : vector<2x64xf32>
    %134 = arith.mulf %130, %129 : vector<2x64xf32>
    %135 = arith.addf %133, %134 : vector<2x64xf32>
    %136 = math.tanh %135 : vector<2x64xf32>
    %137 = arith.mulf %132, %136 : vector<2x64xf32>
    %c5_i32 = arith.constant 5 : i32
    %138 = arith.index_cast %c5_i32 : i32 to index
    %c0_45 = arith.constant 0 : index
    %c0_46 = arith.constant 0 : index
    %139 = vector.load %arg2[%138, %c0_45, %c0_46] : memref<8x2x32xf32, #tpu.memory_space<vmem>>, vector<1x2x32xf32>
    %140 = vector.shape_cast %139 : vector<1x2x32xf32> to vector<2x32xf32>
    %cst_47 = arith.constant dense<0.000000e+00> : vector<2x256xf32>
    %141 = tpu.matmul %140, %3, %cst_47 {dimension_numbers = #tpu.dot_dimension_numbers<[1], [0], [0], [1], [0, 0, 1, 1], [], []>} : vector<2x32xf32>, vector<32x256xf32>, vector<2x256xf32> -> vector<2x256xf32>
    %cst_48 = arith.constant dense<0.000000e+00> : vector<2x256xf32>
    %142 = tpu.matmul %137, %4, %cst_48 {dimension_numbers = #tpu.dot_dimension_numbers<[1], [0], [0], [1], [0, 0, 1, 1], [], []>} : vector<2x64xf32>, vector<64x256xf32>, vector<2x256xf32> -> vector<2x256xf32>
    %143 = arith.addf %142, %141 : vector<2x256xf32>
    %144 = vector.broadcast %5 : vector<1x256xf32> to vector<2x256xf32>
    %145 = arith.addf %143, %144 : vector<2x256xf32>
    %146 = vector.extract_strided_slice %145 {offsets = [0, 0], sizes = [2, 192], strides = [1, 1]} : vector<2x256xf32> to vector<2x192xf32>
    %cst_49 = arith.constant 5.000000e-01 : f32
    %147 = vector.broadcast %cst_49 : f32 to vector<2x192xf32>
    %148 = arith.mulf %147, %146 : vector<2x192xf32>
    %149 = math.tanh %148 : vector<2x192xf32>
    %cst_50 = arith.constant 5.000000e-01 : f32
    %150 = vector.broadcast %cst_50 : f32 to vector<2x192xf32>
    %151 = arith.mulf %150, %149 : vector<2x192xf32>
    %cst_51 = arith.constant 5.000000e-01 : f32
    %152 = vector.broadcast %cst_51 : f32 to vector<2x192xf32>
    %153 = arith.addf %151, %152 : vector<2x192xf32>
    %154 = vector.extract_strided_slice %145 {offsets = [0, 192], sizes = [2, 64], strides = [1, 1]} : vector<2x256xf32> to vector<2x64xf32>
    %155 = math.tanh %154 : vector<2x64xf32>
    %156 = vector.extract_strided_slice %153 {offsets = [0, 0], sizes = [2, 64], strides = [1, 1]} : vector<2x192xf32> to vector<2x64xf32>
    %157 = vector.extract_strided_slice %153 {offsets = [0, 64], sizes = [2, 64], strides = [1, 1]} : vector<2x192xf32> to vector<2x64xf32>
    %158 = vector.extract_strided_slice %153 {offsets = [0, 128], sizes = [2, 64], strides = [1, 1]} : vector<2x192xf32> to vector<2x64xf32>
    %159 = arith.mulf %157, %135 : vector<2x64xf32>
    %160 = arith.mulf %156, %155 : vector<2x64xf32>
    %161 = arith.addf %159, %160 : vector<2x64xf32>
    %162 = math.tanh %161 : vector<2x64xf32>
    %163 = arith.mulf %158, %162 : vector<2x64xf32>
    %c6_i32 = arith.constant 6 : i32
    %164 = arith.index_cast %c6_i32 : i32 to index
    %c0_52 = arith.constant 0 : index
    %c0_53 = arith.constant 0 : index
    %165 = vector.load %arg2[%164, %c0_52, %c0_53] : memref<8x2x32xf32, #tpu.memory_space<vmem>>, vector<1x2x32xf32>
    %166 = vector.shape_cast %165 : vector<1x2x32xf32> to vector<2x32xf32>
    %cst_54 = arith.constant dense<0.000000e+00> : vector<2x256xf32>
    %167 = tpu.matmul %166, %3, %cst_54 {dimension_numbers = #tpu.dot_dimension_numbers<[1], [0], [0], [1], [0, 0, 1, 1], [], []>} : vector<2x32xf32>, vector<32x256xf32>, vector<2x256xf32> -> vector<2x256xf32>
    %cst_55 = arith.constant dense<0.000000e+00> : vector<2x256xf32>
    %168 = tpu.matmul %163, %4, %cst_55 {dimension_numbers = #tpu.dot_dimension_numbers<[1], [0], [0], [1], [0, 0, 1, 1], [], []>} : vector<2x64xf32>, vector<64x256xf32>, vector<2x256xf32> -> vector<2x256xf32>
    %169 = arith.addf %168, %167 : vector<2x256xf32>
    %170 = vector.broadcast %5 : vector<1x256xf32> to vector<2x256xf32>
    %171 = arith.addf %169, %170 : vector<2x256xf32>
    %172 = vector.extract_strided_slice %171 {offsets = [0, 0], sizes = [2, 192], strides = [1, 1]} : vector<2x256xf32> to vector<2x192xf32>
    %cst_56 = arith.constant 5.000000e-01 : f32
    %173 = vector.broadcast %cst_56 : f32 to vector<2x192xf32>
    %174 = arith.mulf %173, %172 : vector<2x192xf32>
    %175 = math.tanh %174 : vector<2x192xf32>
    %cst_57 = arith.constant 5.000000e-01 : f32
    %176 = vector.broadcast %cst_57 : f32 to vector<2x192xf32>
    %177 = arith.mulf %176, %175 : vector<2x192xf32>
    %cst_58 = arith.constant 5.000000e-01 : f32
    %178 = vector.broadcast %cst_58 : f32 to vector<2x192xf32>
    %179 = arith.addf %177, %178 : vector<2x192xf32>
    %180 = vector.extract_strided_slice %171 {offsets = [0, 192], sizes = [2, 64], strides = [1, 1]} : vector<2x256xf32> to vector<2x64xf32>
    %181 = math.tanh %180 : vector<2x64xf32>
    %182 = vector.extract_strided_slice %179 {offsets = [0, 0], sizes = [2, 64], strides = [1, 1]} : vector<2x192xf32> to vector<2x64xf32>
    %183 = vector.extract_strided_slice %179 {offsets = [0, 64], sizes = [2, 64], strides = [1, 1]} : vector<2x192xf32> to vector<2x64xf32>
    %184 = vector.extract_strided_slice %179 {offsets = [0, 128], sizes = [2, 64], strides = [1, 1]} : vector<2x192xf32> to vector<2x64xf32>
    %185 = arith.mulf %183, %161 : vector<2x64xf32>
    %186 = arith.mulf %182, %181 : vector<2x64xf32>
    %187 = arith.addf %185, %186 : vector<2x64xf32>
    %188 = math.tanh %187 : vector<2x64xf32>
    %189 = arith.mulf %184, %188 : vector<2x64xf32>
    %c7_i32 = arith.constant 7 : i32
    %190 = arith.index_cast %c7_i32 : i32 to index
    %c0_59 = arith.constant 0 : index
    %c0_60 = arith.constant 0 : index
    %191 = vector.load %arg2[%190, %c0_59, %c0_60] : memref<8x2x32xf32, #tpu.memory_space<vmem>>, vector<1x2x32xf32>
    %192 = vector.shape_cast %191 : vector<1x2x32xf32> to vector<2x32xf32>
    %cst_61 = arith.constant dense<0.000000e+00> : vector<2x256xf32>
    %193 = tpu.matmul %192, %3, %cst_61 {dimension_numbers = #tpu.dot_dimension_numbers<[1], [0], [0], [1], [0, 0, 1, 1], [], []>} : vector<2x32xf32>, vector<32x256xf32>, vector<2x256xf32> -> vector<2x256xf32>
    %cst_62 = arith.constant dense<0.000000e+00> : vector<2x256xf32>
    %194 = tpu.matmul %189, %4, %cst_62 {dimension_numbers = #tpu.dot_dimension_numbers<[1], [0], [0], [1], [0, 0, 1, 1], [], []>} : vector<2x64xf32>, vector<64x256xf32>, vector<2x256xf32> -> vector<2x256xf32>
    %195 = arith.addf %194, %193 : vector<2x256xf32>
    %196 = vector.broadcast %5 : vector<1x256xf32> to vector<2x256xf32>
    %197 = arith.addf %195, %196 : vector<2x256xf32>
    %198 = vector.extract_strided_slice %197 {offsets = [0, 0], sizes = [2, 192], strides = [1, 1]} : vector<2x256xf32> to vector<2x192xf32>
    %cst_63 = arith.constant 5.000000e-01 : f32
    %199 = vector.broadcast %cst_63 : f32 to vector<2x192xf32>
    %200 = arith.mulf %199, %198 : vector<2x192xf32>
    %201 = math.tanh %200 : vector<2x192xf32>
    %cst_64 = arith.constant 5.000000e-01 : f32
    %202 = vector.broadcast %cst_64 : f32 to vector<2x192xf32>
    %203 = arith.mulf %202, %201 : vector<2x192xf32>
    %cst_65 = arith.constant 5.000000e-01 : f32
    %204 = vector.broadcast %cst_65 : f32 to vector<2x192xf32>
    %205 = arith.addf %203, %204 : vector<2x192xf32>
    %206 = vector.extract_strided_slice %197 {offsets = [0, 192], sizes = [2, 64], strides = [1, 1]} : vector<2x256xf32> to vector<2x64xf32>
    %207 = math.tanh %206 : vector<2x64xf32>
    %208 = vector.extract_strided_slice %205 {offsets = [0, 0], sizes = [2, 64], strides = [1, 1]} : vector<2x192xf32> to vector<2x64xf32>
    %209 = vector.extract_strided_slice %205 {offsets = [0, 64], sizes = [2, 64], strides = [1, 1]} : vector<2x192xf32> to vector<2x64xf32>
    %210 = vector.extract_strided_slice %205 {offsets = [0, 128], sizes = [2, 64], strides = [1, 1]} : vector<2x192xf32> to vector<2x64xf32>
    %211 = arith.mulf %209, %187 : vector<2x64xf32>
    %212 = arith.mulf %208, %207 : vector<2x64xf32>
    %213 = arith.addf %211, %212 : vector<2x64xf32>
    %214 = math.tanh %213 : vector<2x64xf32>
    %215 = arith.mulf %210, %214 : vector<2x64xf32>
    %c8_i32 = arith.constant 8 : i32
    %c0_66 = arith.constant 0 : index
    %c0_67 = arith.constant 0 : index
    %216 = vector.load %arg9[%c0_66, %c0_67] : memref<2x64xf32, #tpu.memory_space<vmem>>, vector<2x64xf32>
    tpu.vector_store %arg9[%c0_66, %c0_67], %215 {strides = array<i32>} : memref<2x64xf32, #tpu.memory_space<vmem>>, vector<2x64xf32>,
    %c0_68 = arith.constant 0 : index
    %c0_69 = arith.constant 0 : index
    %217 = vector.load %arg10[%c0_68, %c0_69] : memref<2x64xf32, #tpu.memory_space<vmem>>, vector<2x64xf32>
    tpu.vector_store %arg10[%c0_68, %c0_69], %213 {strides = array<i32>} : memref<2x64xf32, #tpu.memory_space<vmem>>, vector<2x64xf32>,
    %c0_i32_70 = arith.constant 0 : i32
    %218 = arith.cmpi eq, %arg1, %c0_i32_70 : i32
    %219 = arith.extui %218 : i1 to i32
    %c0_i32_71 = arith.constant 0 : i32
    %220 = arith.cmpi ne, %219, %c0_i32_71 : i32
    scf.if %220 {
      %c0_72 = arith.constant 0 : index
      %c0_73 = arith.constant 0 : index
      %221 = vector.load %arg6[%c0_72, %c0_73] : memref<64x2xf32, #tpu.memory_space<vmem>>, vector<64x2xf32>
      %cst_74 = arith.constant dense<0.000000e+00> : vector<2x2xf32>
      %222 = tpu.matmul %215, %221, %cst_74 {dimension_numbers = #tpu.dot_dimension_numbers<[1], [0], [0], [1], [0, 0, 1, 1], [], []>} : vector<2x64xf32>, vector<64x2xf32>, vector<2x2xf32> -> vector<2x2xf32>
      %c0_75 = arith.constant 0 : index
      %c0_76 = arith.constant 0 : index
      %223 = vector.load %arg7[%c0_75, %c0_76] : memref<1x2xf32, #tpu.memory_space<vmem>>, vector<1x2xf32>
      %224 = vector.broadcast %223 : vector<1x2xf32> to vector<2x2xf32>
      %225 = arith.addf %222, %224 : vector<2x2xf32>
      %c0_77 = arith.constant 0 : index
      %c0_78 = arith.constant 0 : index
      %226 = vector.load %arg8[%c0_77, %c0_78] : memref<2x2xf32, #tpu.memory_space<vmem>>, vector<2x2xf32>
      tpu.vector_store %arg8[%c0_77, %c0_78], %225 {strides = array<i32>} : memref<2x2xf32, #tpu.memory_space<vmem>>, vector<2x2xf32>,
    } else {
    }
    return
  }
  func.func @transform_0(%arg0: i32, %arg1: i32) -> (i32, i32, i32) {
    %c0_i32 = arith.constant 0 : i32
    %c0_i32_0 = arith.constant 0 : i32
    return %arg1, %arg0, %c0_i32 : i32, i32, i32
  }
  func.func @transform_1(%arg0: i32, %arg1: i32) -> (i32, i32) {
    %c0_i32 = arith.constant 0 : i32
    %c0_i32_0 = arith.constant 0 : i32
    %c0_i32_1 = arith.constant 0 : i32
    return %c0_i32, %c0_i32_0 : i32, i32
  }
  func.func @transform_2(%arg0: i32, %arg1: i32) -> (i32, i32) {
    %c0_i32 = arith.constant 0 : i32
    %c0_i32_0 = arith.constant 0 : i32
    %c0_i32_1 = arith.constant 0 : i32
    return %c0_i32, %c0_i32_0 : i32, i32
  }
  func.func @transform_3(%arg0: i32, %arg1: i32) -> (i32, i32) {
    %c0_i32 = arith.constant 0 : i32
    %c0_i32_0 = arith.constant 0 : i32
    %c0_i32_1 = arith.constant 0 : i32
    return %c0_i32, %c0_i32_0 : i32, i32
  }
  func.func @transform_4(%arg0: i32, %arg1: i32) -> (i32, i32) {
    %c0_i32 = arith.constant 0 : i32
    %c0_i32_0 = arith.constant 0 : i32
    %c0_i32_1 = arith.constant 0 : i32
    return %c0_i32, %c0_i32_0 : i32, i32
  }
  func.func @transform_5(%arg0: i32, %arg1: i32) -> (i32, i32) {
    %c0_i32 = arith.constant 0 : i32
    %c0_i32_0 = arith.constant 0 : i32
    %c0_i32_1 = arith.constant 0 : i32
    return %c0_i32, %c0_i32_0 : i32, i32
  }
  func.func @transform_6(%arg0: i32, %arg1: i32) -> (i32, i32) {
    %c0_i32 = arith.constant 0 : i32
    %c0_i32_0 = arith.constant 0 : i32
    return %arg0, %c0_i32 : i32, i32
  }
}

</mosaic_0001>

<bundles_post_ra>
// kernel: tpu_custom_call.1
= control target key start
LH: loop header
LB: loop body
LE: loop exit
PB: predicated region body
PF: predicated region fallthrough
CT: control target
= control target key end

     0   :  { %11 = vsyncpa [#allocation5], 0  ;;  %s2397_s0 = inlined_call_operand.hbm [shape: f32[8,2,32], index: 0, kind: input, shape index: {}]   ;;  %s2398_s1 = inlined_call_operand.vmem [shape: f32[32,256], index: 1, kind: input, shape index: {}]   ;;  %s2399_s2 = inlined_call_operand.hbm [shape: f32[64,256], index: 2, kind: input, shape index: {}]   ;;  %s2400_s3 = inlined_call_operand.vmem [shape: f32[1,256], index: 3, kind: input, shape index: {}]   ;;  %s2401_s4 = inlined_call_operand.vmem [shape: f32[64,2], index: 4, kind: input, shape index: {}]   ;;  %s2402_s5 = inlined_call_operand.vmem [shape: f32[1,2], index: 5, kind: input, shape index: {}]   ;;  %s2403_s6 = inlined_call_operand.hbm [shape: f32[2,2], index: 6, kind: output, shape index: {}]  }
   0x1   :  { %12 = vsyncpa [#allocation8], 0 }
   0x2   :  { %13 = vsyncpa [#allocation6], 0  ;;  %s2055_s21 = smov [#allocation4]   ;;  %s1983_s25 = scalar_lea.hbm %s2397_s0, 256 }
   0x3   :  { %s19_s22 = sshll.u32 %s2055_s21, 4  ;;  %p1984_p0 = scmp.ne.s32.totalorder %s2397_s0, %s1983_s25  ;;  %s20_s22 = int_to_ptr.vmem [resolvable:$true] %s19_s22 }
   0x4   :  { %p1987_p1 = scmp.lt.u32.totalorder %s1983_s25, %s2397_s0 }
   0x6   :  { %p1989_p2 = pnand %p1987_p1, %p1984_p0 }
   0x8   :  { %1992 = shalt.err (!%p1989_p2)
}
   0x9   :  { %s1993_s30 = scalar_lea.vmem %s20_s22, 256  ;;  %p1998_p4 = scmp.lt.s32.totalorder %s20_s22, %s20_s22 }
   0xa   :  { %p1994_p3 = scmp.ne.s32.totalorder %s20_s22, %s1993_s30  ;;  %p1999_p5 = scmp.lt.s32.totalorder %s1993_s30, %s1993_s30 }
   0xc   :  { %p2000_p6 = por %p1999_p5, %p1998_p4 }
   0xe   :  { %p2001_p7 = pnand %p2000_p6, %p1994_p3 }
  0x10   :  { %2004 = shalt.err (!%p2001_p7)
}
  0x11   :  { %s2056_s7 = smov 32   ;;  %s2057_s8 = smov 2  }
  0x12   :  { %25 = dma.hbm_to_vmem [thread:$0]  %s2397_s0, 256, %s20_s22, [#allocation5], %s2056_s7, %s2056_s7, %s2057_s8  }
  0x13   :  { %s2058_s11 = smov [#allocation7]   ;;  %s2005_s15 = scalar_lea.hbm %s2399_s2, 2048 }
  0x14   :  { %s33_s12 = sshll.u32 %s2058_s11, 4  ;;  %p2006_p8 = scmp.ne.s32.totalorder %s2399_s2, %s2005_s15  ;;  %s34_s12 = int_to_ptr.vmem [resolvable:$true] %s33_s12 }
  0x15   :  { %p2009_p9 = scmp.lt.u32.totalorder %s2005_s15, %s2399_s2 }
  0x17   :  { %p2011_p10 = pnand %p2009_p9, %p2006_p8 }
  0x19   :  { %2014 = shalt.err (!%p2011_p10)
}
  0x1a   :  { %s2015_s20 = scalar_lea.vmem %s34_s12, 2048  ;;  %p2020_p12 = scmp.lt.s32.totalorder %s34_s12, %s34_s12 }
  0x1b   :  { %p2016_p11 = scmp.ne.s32.totalorder %s34_s12, %s2015_s20  ;;  %p2021_p13 = scmp.lt.s32.totalorder %s2015_s20, %s2015_s20 }
  0x1d   :  { %p2022_p0 = por %p2021_p13, %p2020_p12 }
  0x1f   :  { %p2023_p1 = pnand %p2022_p0, %p2016_p11 }
  0x21   :  { %2026 = shalt.err (!%p2023_p1)
}
  0x22   :  { %s2059_s0 = smov 256   ;;  %s2060_s21 = smov 16  }
  0x23   :  { %39 = dma.hbm_to_vmem [thread:$0]  %s2399_s2, 2048, %s34_s12, [#allocation8], %s2059_s0, %s2059_s0, %s2060_s21  }
  0x24   :  { %2049 = dma.done.wait [#allocation5], 256  }
  0x25   :  { %2050 = vsyncadd [#allocation5], 4294967040 }
  0x26   :  { %2051 = dma.done.wait [#allocation8], 2048  }
  0x27   :  { %2052 = vsyncadd [#allocation8], 4294965248  ;;  %vm56_vm0 = vcmask 517120   ;;  %v2061_v0 = vmov 0.0   ;;  %v68_v1 = vld [vmem:[#allocation7 + $0x8] sm:$0xff]  ;;  %v70_v2 = vld [vmem:[#allocation7 + $0x18] sm:$0xff]  ;;  %v238_v39 = vlaneseq }
  0x28   :  { %155 = vmatprep.mubr.f32.mxu1 %v2061_v0  ;;  %230 = vmatprep.mubr.f32.mxu0 %v2061_v0  ;;  %57 = vst.msk [vmem:[#allocation2] sm:$0x3] %vm56_vm0, %v2061_v0  ;;  %58 = vst.msk [vmem:[#allocation3] sm:$0x3] %vm56_vm0, %v2061_v0  ;;  %v67_v3 = vld [vmem:[#allocation7] sm:$0xff]  ;;  %v2131_v4 = vpack.c.bf16 %v70_v2, %v68_v1  ;;  %v69_v5 = vld [vmem:[#allocation7 + $0x10] sm:$0xff] }
  0x29   :  { %v72_v6 = vld [vmem:[#allocation7 + $0x28] sm:$0xff]  ;;  %v74_v7 = vld [vmem:[#allocation7 + $0x38] sm:$0xff]  ;;  %v2133_v8 = vpack.c.bf16 %v69_v5, %v67_v3  ;;  %v71_v10 = vld [vmem:[#allocation7 + $0x20] sm:$0xff]  ;;  %vm87_vm1 = vcmask 261120   ;;  %vm162_vm2 = vcmask 523264   ;;  %v239_v40 = vshrl.u32 %v238_v39, 7 }
  0x2a   :  { %v2135_v9 = vpack.c.bf16 %v74_v7, %v72_v6  ;;  %v73_v11 = vld [vmem:[#allocation7 + $0x30] sm:$0xff]  ;;  %1697 = vmatprep.subr.bf16.mxu0 %v2131_v4  ;;  %v62_v13 = vld [vmem:[%s2398_s1 + $0x18] sm:$0xff]  ;;  %v61_v15 = vld [vmem:[%s2398_s1 + $0x10] sm:$0xff]  ;;  %s2062_s16 = smov 64   ;;  %vm2064_vm3 = vmmov 0   ;;  %s2065_s7 = smov [#allocation9]  }
  0x2b   :  { %v60_v12 = vld [vmem:[%s2398_s1 + $0x8] sm:$0xff]  ;;  %v59_v14 = vld [vmem:[%s2398_s1] sm:$0xff]  ;;  %1699 = vmatpush1.bf16.msra.mxu0 %v2133_v8  ;;  %v2151_v16 = vpack.c.bf16 %v73_v11, %v71_v10  ;;  %v75_v21 = vld [vmem:[#allocation7 + $0x40] sm:$0xff]  ;;  %v240_v42 = vsub.s32 0, %v239_v40  ;;  %v244_v46 = vsub.s32 1, %v239_v40  ;;  %s1632_s8 = sshll.u32 %s2065_s7, 4  ;;  %s1633_s8 = int_to_ptr.vmem [resolvable:$true] %s1632_s8 }
  0x2c   :  { %v2153_v17 = vpack.c.bf16 %v62_v13, %v60_v12  ;;  %v2155_v18 = vpack.c.bf16 %v61_v15, %v59_v14  ;;  %v76_v19 = vld [vmem:[#allocation7 + $0x48] sm:$0xff]  ;;  %v78_v20 = vld [vmem:[#allocation7 + $0x58] sm:$0xff]  ;;  %1701 = vmatprep.subr.bf16.mxu0 %v2135_v9  ;;  %v77_v23 = vld [vmem:[#allocation7 + $0x50] sm:$0xff]  ;;  %vm1624_vm4 = vcmask 9216   ;;  %s2027_s9 = scalar_lea.vmem %s1633_s8, 32  ;;  %p2032_p3 = scmp.lt.s32.totalorder %s1633_s8, %s1633_s8 }
  0x2d   :  { %v2158_v22 = vpack.c.bf16 %v78_v20, %v76_v19  ;;  %v64_v24 = vld [vmem:[%s2398_s1 + $0x28] sm:$0xff]  ;;  %v66_v25 = vld [vmem:[%s2398_s1 + $0x38] sm:$0xff]  ;;  %v63_v27 = vld [vmem:[%s2398_s1 + $0x20] sm:$0xff]  ;;  %v2179_v32 = vpack.c.bf16 %v77_v23, %v75_v21  ;;  %p2028_p2 = scmp.ne.s32.totalorder %s1633_s8, %s2027_s9  ;;  %p2033_p4 = scmp.lt.s32.totalorder %s2027_s9, %s2027_s9 }
  0x2e   :  { %1689 = vmatprep.subr.bf16.mxu1 %v2153_v17  ;;  %v2167_v26 = vpack.c.bf16 %v66_v25, %v64_v24  ;;  %v65_v28 = vld [vmem:[%s2398_s1 + $0x30] sm:$0xff]  ;;  %v80_v29 = vld [vmem:[#allocation7 + $0x68] sm:$0xff]  ;;  %v81_v35 = vld [vmem:[#allocation7 + $0x70] sm:$0xff] }
  0x2f   :  { %1691 = vmatpush1.bf16.msra.mxu1 %v2155_v18  ;;  %v2176_v30 = vpack.c.bf16 %v65_v28, %v63_v27  ;;  %v82_v31 = vld [vmem:[#allocation7 + $0x78] sm:$0xff]  ;;  %1703 = vmatpush1.bf16.msra.mxu0 %v2151_v16  ;;  %v79_v34 = vld [vmem:[#allocation7 + $0x60] sm:$0xff]  ;;  %v86_v36 = vld [vmem:[#allocation4] sm:$0x3]  ;;  %p2034_p5 = por %p2033_p4, %p2032_p3 }
  0x30   :  { %1693 = vmatprep.subr.bf16.mxu1 %v2167_v26  ;;  %1705 = vmatprep.subr.bf16.mxu0 %v2158_v22  ;;  %v2183_v33 = vpack.c.bf16 %v82_v31, %v80_v29  ;;  %v2187_v37 = vpack.c.bf16 %v81_v35, %v79_v34  ;;  %v84_v38 = vld [vmem:[#allocation2] sm:$0x3]  ;;  %v85_v54 = vld [vmem:[#allocation3] sm:$0x3]  ;;  %v281_v62 = vld [vmem:[#allocation4 + $0x2] sm:$0x3] }
  0x31   :  { %v83_v41 = vld [vmem:[%s2400_s3] sm:$0x3]  ;;  %v459_v31 = vld [vmem:[#allocation4 + $0x4] sm:$0x3]  ;;  %p2035_p6 = pnand %p2034_p5, %p2028_p2 }
  0x32   :  { %v2208_v43 = vrot.slane %v83_v41, %v240_v42  ;;  %v2210_v48 = vrot.slane %v83_v41, %v244_v46 }
  0x33   :  { %1695 = vmatpush1.bf16.msra.mxu1 %v2176_v30  ;;  %1707 = vmatpush1.bf16.msra.mxu0 %v2179_v32 }
  0x34   :  { %1713 = vmatprep.subr.bf16.mxu1 %v2153_v17  ;;  %1709 = vmatprep.subr.bf16.mxu0 %v2183_v33 }
  0x36   :  { %1642 = vmatmul.mubr.msk.f32.vlgmr.msra.gmra.mrb[0].mxu1 %vm87_vm1, %v86_v36 }
  0x37   :  { %1715 = vmatpush1.bf16.msra.mxu1 %v2155_v18  ;;  %349 = vmatprep.mubr.f32.mxu1 %v2061_v0 }
  0x38   :  { %1711 = vmatpush1.bf16.msra.mxu0 %v2187_v37  ;;  %1717 = vmatprep.subr.bf16.mxu1 %v2167_v26 }
  0x39   :  { %1737 = vmatprep.subr.bf16.mxu0 %v2153_v17 }
  0x3b   :  { %1643 = vmatmul.mubr.msk.f32.vlgmr.msra.gmra.mrb[0].mxu0 %vm162_vm2, %v84_v38  ;;  %1719 = vmatpush1.bf16.msra.mxu1 %v2176_v30 }
  0x3c   :  { %1721 = vmatprep.subr.bf16.mxu1 %v2131_v4  ;;  %1739 = vmatpush1.bf16.msra.mxu0 %v2155_v18 }
  0x3d   :  { %1741 = vmatprep.subr.bf16.mxu0 %v2167_v26  ;;  %527 = vmatprep.mubr.f32.mxu0 %v2061_v0 }
  0x3e   :  { %1644 = vmatmul.mubr.msk.f32.vlgmr.msra.gmra.mrb[2].mxu1 %vm87_vm1, %v281_v62 }
  0x3f   :  { %1723 = vmatpush1.bf16.msra.mxu1 %v2133_v8  ;;  %423 = vmatprep.mubr.f32.mxu1 %v2061_v0 }
  0x40   :  { %1743 = vmatpush1.bf16.msra.mxu0 %v2176_v30  ;;  %1725 = vmatprep.subr.bf16.mxu1 %v2135_v9 }
  0x41   :  { %1745 = vmatprep.subr.bf16.mxu0 %v2131_v4 }
  0x43   :  { %1727 = vmatpush1.bf16.msra.mxu1 %v2151_v16  ;;  %1646 = vmatmul.mubr.msk.f32.vlgmr.msra.gmra.mrb[2].mxu0 %vm87_vm1, %v459_v31 }
  0x44   :  { %1729 = vmatprep.subr.bf16.mxu1 %v2158_v22  ;;  %1747 = vmatpush1.bf16.msra.mxu0 %v2133_v8 }
  0x45   :  { %601 = vmatprep.mubr.f32.mxu0 %v2061_v0  ;;  %1749 = vmatprep.subr.bf16.mxu0 %v2135_v9 }
  0x47   :  { %1731 = vmatpush1.bf16.msra.mxu1 %v2179_v32 }
  0x48   :  { %1733 = vmatprep.subr.bf16.mxu1 %v2183_v33  ;;  %1751 = vmatpush1.bf16.msra.mxu0 %v2151_v16 }
  0x49   :  { %1753 = vmatprep.subr.bf16.mxu0 %v2158_v22 }
  0x4b   :  { %1735 = vmatpush1.bf16.msra.mxu1 %v2187_v37 }
  0x4c   :  { %1761 = vmatprep.subr.bf16.mxu1 %v2153_v17  ;;  %1755 = vmatpush1.bf16.msra.mxu0 %v2179_v32 }
  0x4d   :  { %1757 = vmatprep.subr.bf16.mxu0 %v2183_v33 }
  0x50   :  { %1759 = vmatpush1.bf16.msra.mxu0 %v2187_v37 }
  0x51   :  { %1785 = vmatprep.subr.bf16.mxu0 %v2153_v17 }
 0x109   :  { %v157_v44 = vpop.f32.mrb[0].mxu1 }
 0x10a   :  { %v159_v45 = vpop.f32.mrb[1].mxu1 }
 0x10e   :  { %v232_v47 = vpop.f32.mrb[0].mxu0 }
 0x10f   :  { %v233_v49 = vadd.f32 %v232_v47, %v157_v44  ;;  %v234_v50 = vpop.f32.mrb[1].mxu0 }
 0x110   :  { %v235_v51 = vadd.f32 %v234_v50, %v159_v45 }
 0x111   :  { %v248_v55 = vadd.f32 %v2208_v43, %v233_v49 }
 0x112   :  { %v249_v52 = vadd.f32 %v2210_v48, %v235_v51 }
 0x113   :  { %v250_v56 = vmul.f32 0.5, %v248_v55 }
 0x114   :  { %1919 = vtanh.f32 %v249_v52  ;;  %v251_v6 = vmul.f32 0.5, %v249_v52 }
 0x115   :  { %1921 = vtanh.f32 %v250_v56 }
 0x11e   :  { %v1920_v53 = vpop.eup %1919 }
 0x11f   :  { %265 = vrot.lane.b32.xlu0 %v1920_v53, %s2062_s16  ;;  %v1922_v57 = vpop.eup %1921 }
 0x120   :  { %v254_v58 = vmul.f32 0.5, %v1922_v57 }
 0x122   :  { %v256_v59 = vadd.f32 0.5, %v254_v58  ;;  %v637_v58 = vld [vmem:[#allocation4 + $0x6] sm:$0x3] }
 0x123   :  { %260 = vrot.lane.b32.xlu0 %v85_v54, %s2062_s16 }
 0x191   :  { %v266_v60 = vpop.permute.xlu0 %265 }
 0x192   :  { %v268_v61 = vmul.f32 %v266_v60, %v256_v59 }
 0x194   :  { %270 = vrot.lane.b32.xlu1 %v268_v61, %s2062_s16 }
 0x195   :  { %v261_v63 = vpop.permute.xlu0 %260 }
 0x196   :  { %v263_v1 = vmul.f32 %v261_v63, %v256_v59 }
 0x206   :  { %v271_v2 = vpop.permute.xlu1 %270 }
 0x207   :  { %v273_v3 = vadd.f32 %v271_v2, %v263_v1 }
 0x209   :  { %1923 = vtanh.f32 %v273_v3 }
 0x20a   :  { %1925 = vtanh.f32 %v251_v6 }
 0x213   :  { %v1924_v5 = vpop.eup %1923 }
 0x214   :  { %276 = vrot.lane.b32.xlu1 %v1924_v5, %s2062_s16  ;;  %v1926_v7 = vpop.eup %1925 }
 0x215   :  { %v255_v10 = vmul.f32 0.5, %v1926_v7 }
 0x217   :  { %v257_v11 = vadd.f32 0.5, %v255_v10 }
 0x286   :  { %v277_v12 = vpop.permute.xlu1 %276 }
 0x287   :  { %v279_v13 = vmul.f32 %v277_v12, %v257_v11 }
 0x289   :  { %1645 = vmatmul.mubr.msk.f32.vlgmr.msra.gmra.mrb[2].mxu1 %vm162_vm2, %v279_v13 }
 0x28a   :  { %1763 = vmatpush1.bf16.msra.mxu1 %v2155_v18  ;;  %705 = vmatprep.mubr.f32.mxu1 %v2061_v0 }
 0x28b   :  { %1765 = vmatprep.subr.bf16.mxu1 %v2167_v26 }
 0x28e   :  { %1767 = vmatpush1.bf16.msra.mxu1 %v2176_v30 }
 0x28f   :  { %1769 = vmatprep.subr.bf16.mxu1 %v2131_v4 }
 0x291   :  { %1648 = vmatmul.mubr.msk.f32.vlgmr.msra.gmra.mrb[4].mxu1 %vm87_vm1, %v637_v58 }
 0x292   :  { %1771 = vmatpush1.bf16.msra.mxu1 %v2133_v8  ;;  %779 = vmatprep.mubr.f32.mxu1 %v2061_v0 }
 0x293   :  { %1773 = vmatprep.subr.bf16.mxu1 %v2135_v9 }
 0x296   :  { %1775 = vmatpush1.bf16.msra.mxu1 %v2151_v16 }
 0x297   :  { %1777 = vmatprep.subr.bf16.mxu1 %v2158_v22 }
 0x29a   :  { %1779 = vmatpush1.bf16.msra.mxu1 %v2179_v32 }
 0x29b   :  { %1781 = vmatprep.subr.bf16.mxu1 %v2183_v33 }
 0x29e   :  { %1783 = vmatpush1.bf16.msra.mxu1 %v2187_v37 }
 0x29f   :  { %1809 = vmatprep.subr.bf16.mxu1 %v2153_v17 }
 0x35c   :  { %v425_v14 = vpop.f32.mrb[2].mxu1 }
 0x35d   :  { %v427_v15 = vpop.f32.mrb[3].mxu1  ;;  %v430_v21 = vadd.f32 %v425_v14, %v2208_v43 }
 0x35e   :  { %v431_v19 = vadd.f32 %v427_v15, %v2210_v48 }
 0x35f   :  { %v432_v23 = vmul.f32 0.5, %v430_v21 }
 0x360   :  { %1927 = vtanh.f32 %v431_v19  ;;  %v433_v39 = vmul.f32 0.5, %v431_v19 }
 0x361   :  { %1929 = vtanh.f32 %v432_v23 }
 0x36a   :  { %v1928_v20 = vpop.eup %1927 }
 0x36b   :  { %443 = vrot.lane.b32.xlu0 %v1928_v20, %s2062_s16  ;;  %v1930_v24 = vpop.eup %1929 }
 0x36c   :  { %v436_v25 = vmul.f32 0.5, %v1930_v24  ;;  %v815_v24 = vld [vmem:[#allocation4 + $0x8] sm:$0x3] }
 0x36e   :  { %v438_v27 = vadd.f32 0.5, %v436_v25 }
 0x370   :  { %v441_v34 = vmul.f32 %v438_v27, %v273_v3 }
 0x3dd   :  { %v444_v28 = vpop.permute.xlu0 %443 }
 0x3de   :  { %v446_v29 = vmul.f32 %v444_v28, %v438_v27 }
 0x3e0   :  { %448 = vrot.lane.b32.xlu1 %v446_v29, %s2062_s16 }
 0x452   :  { %v449_v35 = vpop.permute.xlu1 %448 }
 0x453   :  { %v451_v36 = vadd.f32 %v449_v35, %v441_v34 }
 0x455   :  { %1931 = vtanh.f32 %v451_v36 }
 0x456   :  { %1933 = vtanh.f32 %v433_v39 }
 0x45f   :  { %v1932_v38 = vpop.eup %1931 }
 0x460   :  { %454 = vrot.lane.b32.xlu0 %v1932_v38, %s2062_s16  ;;  %v1934_v40 = vpop.eup %1933 }
 0x461   :  { %v437_v41 = vmul.f32 0.5, %v1934_v40 }
 0x463   :  { %v439_v42 = vadd.f32 0.5, %v437_v41 }
 0x4d2   :  { %v455_v44 = vpop.permute.xlu0 %454 }
 0x4d3   :  { %v457_v45 = vmul.f32 %v455_v44, %v439_v42 }
 0x4d5   :  { %1647 = vmatmul.mubr.msk.f32.vlgmr.msra.gmra.mrb[2].mxu0 %vm162_vm2, %v457_v45 }
 0x4d6   :  { %1787 = vmatpush1.bf16.msra.mxu0 %v2155_v18  ;;  %883 = vmatprep.mubr.f32.mxu0 %v2061_v0 }
 0x4d7   :  { %1789 = vmatprep.subr.bf16.mxu0 %v2167_v26 }
 0x4da   :  { %1791 = vmatpush1.bf16.msra.mxu0 %v2176_v30 }
 0x4db   :  { %1793 = vmatprep.subr.bf16.mxu0 %v2131_v4 }
 0x4dd   :  { %1650 = vmatmul.mubr.msk.f32.vlgmr.msra.gmra.mrb[4].mxu0 %vm87_vm1, %v815_v24 }
 0x4de   :  { %1795 = vmatpush1.bf16.msra.mxu0 %v2133_v8  ;;  %957 = vmatprep.mubr.f32.mxu0 %v2061_v0 }
 0x4df   :  { %1797 = vmatprep.subr.bf16.mxu0 %v2135_v9 }
 0x4e2   :  { %1799 = vmatpush1.bf16.msra.mxu0 %v2151_v16 }
 0x4e3   :  { %1801 = vmatprep.subr.bf16.mxu0 %v2158_v22 }
 0x4e6   :  { %1803 = vmatpush1.bf16.msra.mxu0 %v2179_v32 }
 0x4e7   :  { %1805 = vmatprep.subr.bf16.mxu0 %v2183_v33 }
 0x4ea   :  { %1807 = vmatpush1.bf16.msra.mxu0 %v2187_v37 }
 0x4eb   :  { %1833 = vmatprep.subr.bf16.mxu0 %v2153_v17 }
 0x5a8   :  { %v603_v46 = vpop.f32.mrb[2].mxu0 }
 0x5a9   :  { %v605_v47 = vpop.f32.mrb[3].mxu0  ;;  %v608_v51 = vadd.f32 %v603_v46, %v2208_v43 }
 0x5aa   :  { %v609_v49 = vadd.f32 %v605_v47, %v2210_v48 }
 0x5ab   :  { %v610_v52 = vmul.f32 0.5, %v608_v51 }
 0x5ac   :  { %1935 = vtanh.f32 %v609_v49  ;;  %v611_v63 = vmul.f32 0.5, %v609_v49 }
 0x5ad   :  { %1937 = vtanh.f32 %v610_v52 }
 0x5b6   :  { %v1936_v50 = vpop.eup %1935 }
 0x5b7   :  { %621 = vrot.lane.b32.xlu1 %v1936_v50, %s2062_s16  ;;  %v1938_v53 = vpop.eup %1937 }
 0x5b8   :  { %v614_v54 = vmul.f32 0.5, %v1938_v53  ;;  %v993_v53 = vld [vmem:[#allocation4 + $0xa] sm:$0x3] }
 0x5ba   :  { %v616_v55 = vadd.f32 0.5, %v614_v54 }
 0x5bc   :  { %v619_v59 = vmul.f32 %v616_v55, %v451_v36 }
 0x629   :  { %v622_v56 = vpop.permute.xlu1 %621 }
 0x62a   :  { %v624_v57 = vmul.f32 %v622_v56, %v616_v55 }
 0x62c   :  { %626 = vrot.lane.b32.xlu0 %v624_v57, %s2062_s16 }
 0x69e   :  { %v627_v60 = vpop.permute.xlu0 %626 }
 0x69f   :  { %v629_v61 = vadd.f32 %v627_v60, %v619_v59 }
 0x6a1   :  { %1939 = vtanh.f32 %v629_v61 }
 0x6a2   :  { %1941 = vtanh.f32 %v611_v63 }
 0x6ab   :  { %v1940_v62 = vpop.eup %1939 }
 0x6ac   :  { %632 = vrot.lane.b32.xlu1 %v1940_v62, %s2062_s16  ;;  %v1942_v1 = vpop.eup %1941 }
 0x6ad   :  { %v615_v2 = vmul.f32 0.5, %v1942_v1 }
 0x6af   :  { %v617_v3 = vadd.f32 0.5, %v615_v2 }
 0x71e   :  { %v633_v5 = vpop.permute.xlu1 %632 }
 0x71f   :  { %v635_v6 = vmul.f32 %v633_v5, %v617_v3 }
 0x721   :  { %1649 = vmatmul.mubr.msk.f32.vlgmr.msra.gmra.mrb[4].mxu1 %vm162_vm2, %v635_v6 }
 0x722   :  { %1811 = vmatpush1.bf16.msra.mxu1 %v2155_v18  ;;  %1061 = vmatprep.mubr.f32.mxu1 %v2061_v0 }
 0x723   :  { %1813 = vmatprep.subr.bf16.mxu1 %v2167_v26 }
 0x726   :  { %1815 = vmatpush1.bf16.msra.mxu1 %v2176_v30 }
 0x727   :  { %1817 = vmatprep.subr.bf16.mxu1 %v2131_v4 }
 0x729   :  { %1652 = vmatmul.mubr.msk.f32.vlgmr.msra.gmra.mrb[6].mxu1 %vm87_vm1, %v993_v53 }
 0x72a   :  { %1819 = vmatpush1.bf16.msra.mxu1 %v2133_v8  ;;  %1135 = vmatprep.mubr.f32.mxu1 %v2061_v0 }
 0x72b   :  { %1821 = vmatprep.subr.bf16.mxu1 %v2135_v9 }
 0x72e   :  { %1823 = vmatpush1.bf16.msra.mxu1 %v2151_v16 }
 0x72f   :  { %1825 = vmatprep.subr.bf16.mxu1 %v2158_v22 }
 0x732   :  { %1827 = vmatpush1.bf16.msra.mxu1 %v2179_v32 }
 0x733   :  { %1829 = vmatprep.subr.bf16.mxu1 %v2183_v33 }
 0x736   :  { %1831 = vmatpush1.bf16.msra.mxu1 %v2187_v37 }
 0x737   :  { %1857 = vmatprep.subr.bf16.mxu1 %v2153_v17 }
 0x7f4   :  { %v781_v7 = vpop.f32.mrb[4].mxu1 }
 0x7f5   :  { %v783_v10 = vpop.f32.mrb[5].mxu1  ;;  %v786_v13 = vadd.f32 %v781_v7, %v2208_v43 }
 0x7f6   :  { %v787_v11 = vadd.f32 %v783_v10, %v2210_v48 }
 0x7f7   :  { %v788_v14 = vmul.f32 0.5, %v786_v13 }
 0x7f8   :  { %1943 = vtanh.f32 %v787_v11  ;;  %v789_v31 = vmul.f32 0.5, %v787_v11 }
 0x7f9   :  { %1945 = vtanh.f32 %v788_v14 }
 0x802   :  { %v1944_v12 = vpop.eup %1943 }
 0x803   :  { %799 = vrot.lane.b32.xlu0 %v1944_v12, %s2062_s16  ;;  %v1946_v15 = vpop.eup %1945 }
 0x804   :  { %v792_v19 = vmul.f32 0.5, %v1946_v15 }
 0x806   :  { %v794_v20 = vadd.f32 0.5, %v792_v19 }
 0x808   :  { %v797_v25 = vmul.f32 %v794_v20, %v629_v61 }
 0x875   :  { %v800_v21 = vpop.permute.xlu0 %799 }
 0x876   :  { %v802_v23 = vmul.f32 %v800_v21, %v794_v20 }
 0x878   :  { %804 = vrot.lane.b32.xlu1 %v802_v23, %s2062_s16 }
 0x8ea   :  { %v805_v27 = vpop.permute.xlu1 %804 }
 0x8eb   :  { %v807_v28 = vadd.f32 %v805_v27, %v797_v25 }
 0x8ed   :  { %1947 = vtanh.f32 %v807_v28 }
 0x8ee   :  { %1949 = vtanh.f32 %v789_v31 }
 0x8f7   :  { %v1948_v29 = vpop.eup %1947 }
 0x8f8   :  { %810 = vrot.lane.b32.xlu0 %v1948_v29, %s2062_s16  ;;  %v1950_v34 = vpop.eup %1949 }
 0x8f9   :  { %v793_v35 = vmul.f32 0.5, %v1950_v34 }
 0x8fb   :  { %v795_v36 = vadd.f32 0.5, %v793_v35 }
 0x96a   :  { %v811_v38 = vpop.permute.xlu0 %810 }
 0x96b   :  { %v813_v39 = vmul.f32 %v811_v38, %v795_v36 }
 0x96d   :  { %1651 = vmatmul.mubr.msk.f32.vlgmr.msra.gmra.mrb[4].mxu0 %vm162_vm2, %v813_v39 }
 0x96e   :  { %1835 = vmatpush1.bf16.msra.mxu0 %v2155_v18  ;;  %1239 = vmatprep.mubr.f32.mxu0 %v2061_v0 }
 0x96f   :  { %1837 = vmatprep.subr.bf16.mxu0 %v2167_v26 }
 0x972   :  { %1839 = vmatpush1.bf16.msra.mxu0 %v2176_v30 }
 0x973   :  { %1841 = vmatprep.subr.bf16.mxu0 %v2131_v4 }
 0xa40   :  { %v959_v40 = vpop.f32.mrb[4].mxu0 }
 0xa41   :  { %v961_v41 = vpop.f32.mrb[5].mxu0  ;;  %v964_v45 = vadd.f32 %v959_v40, %v2208_v43 }
 0xa42   :  { %v965_v42 = vadd.f32 %v961_v41, %v2210_v48  ;;  %v1349_v41 = vld [vmem:[#allocation4 + $0xe] sm:$0x3] }
 0xa43   :  { %v966_v46 = vmul.f32 0.5, %v964_v45 }
 0xa44   :  { %1951 = vtanh.f32 %v965_v42  ;;  %v967_v58 = vmul.f32 0.5, %v965_v42 }
 0xa45   :  { %1953 = vtanh.f32 %v966_v46 }
 0xa4e   :  { %v1952_v44 = vpop.eup %1951 }
 0xa4f   :  { %977 = vrot.lane.b32.xlu1 %v1952_v44, %s2062_s16  ;;  %v1954_v47 = vpop.eup %1953 }
 0xa50   :  { %v970_v49 = vmul.f32 0.5, %v1954_v47 }
 0xa52   :  { %v972_v50 = vadd.f32 0.5, %v970_v49 }
 0xa54   :  { %v975_v54 = vmul.f32 %v972_v50, %v807_v28 }
 0xac1   :  { %v978_v51 = vpop.permute.xlu1 %977 }
 0xac2   :  { %v980_v52 = vmul.f32 %v978_v51, %v972_v50 }
 0xac4   :  { %982 = vrot.lane.b32.xlu0 %v980_v52, %s2062_s16 }
 0xb36   :  { %v983_v55 = vpop.permute.xlu0 %982 }
 0xb37   :  { %v985_v56 = vadd.f32 %v983_v55, %v975_v54 }
 0xb39   :  { %1955 = vtanh.f32 %v985_v56 }
 0xb3a   :  { %1957 = vtanh.f32 %v967_v58  ;;  %v1536_v58 = vld [vmem:[%s2401_s4] sm:$0xff] }
 0xb43   :  { %v1956_v57 = vpop.eup %1955 }
 0xb44   :  { %988 = vrot.lane.b32.xlu1 %v1956_v57, %s2062_s16  ;;  %v1958_v59 = vpop.eup %1957 }
 0xb45   :  { %v971_v60 = vmul.f32 0.5, %v1958_v59  ;;  %v2063_v59 = vmov 0.0|0.0  }
 0xb47   :  { %v973_v61 = vadd.f32 0.5, %v971_v60  ;;  %v1538_v60 = vld [vmem:[%s2401_s4 + $0x10] sm:$0xff] }
 0xbb6   :  { %v989_v62 = vpop.permute.xlu1 %988 }
 0xbb7   :  { %v991_v63 = vmul.f32 %v989_v62, %v973_v61  ;;  %v1539_v61 = vld [vmem:[%s2401_s4 + $0x18] sm:$0xff] }
 0xbb8   :  { %v1884_v62 = vpack.c.bf16 %v1539_v61, %v1538_v60 }
 0xbb9   :  { %1653 = vmatmul.mubr.msk.f32.vlgmr.msra.gmra.mrb[6].mxu1 %vm162_vm2, %v991_v63  ;;  %v1540_v63 = vld [vmem:[%s2401_s4 + $0x20] sm:$0xff] }
 0xbba   :  { %1859 = vmatpush1.bf16.msra.mxu1 %v2155_v18  ;;  %1417 = vmatprep.mubr.f32.mxu1 %v2061_v0 }
 0xbbb   :  { %1861 = vmatprep.subr.bf16.mxu1 %v2167_v26 }
 0xbbe   :  { %1863 = vmatpush1.bf16.msra.mxu1 %v2176_v30 }
 0xbbf   :  { %1865 = vmatprep.subr.bf16.mxu1 %v2131_v4  ;;  %v1171_v4 = vld [vmem:[#allocation4 + $0xc] sm:$0x3] }
 0xbc0   :  { %1654 = vmatmul.mubr.msk.f32.vlgmr.msra.gmra.mrb[6].mxu0 %vm87_vm1, %v1171_v4 }
 0xbc1   :  { %1843 = vmatpush1.bf16.msra.mxu0 %v2133_v8  ;;  %1313 = vmatprep.mubr.f32.mxu0 %v2061_v0 }
 0xbc2   :  { %1845 = vmatprep.subr.bf16.mxu0 %v2135_v9  ;;  %1656 = vmatmul.mubr.msk.f32.vlgmr.msra.gmra.mrb[8].mxu1 %vm87_vm1, %v1349_v41 }
 0xbc3   :  { %1867 = vmatpush1.bf16.msra.mxu1 %v2133_v8  ;;  %1491 = vmatprep.mubr.f32.mxu1 %v2061_v0 }
 0xbc4   :  { %1869 = vmatprep.subr.bf16.mxu1 %v2135_v9 }
 0xbc5   :  { %1847 = vmatpush1.bf16.msra.mxu0 %v2151_v16 }
 0xbc6   :  { %1849 = vmatprep.subr.bf16.mxu0 %v2158_v22 }
 0xbc7   :  { %1871 = vmatpush1.bf16.msra.mxu1 %v2151_v16 }
 0xbc8   :  { %1873 = vmatprep.subr.bf16.mxu1 %v2158_v22 }
 0xbc9   :  { %1851 = vmatpush1.bf16.msra.mxu0 %v2179_v32 }
 0xbca   :  { %1853 = vmatprep.subr.bf16.mxu0 %v2183_v33 }
 0xbcb   :  { %1875 = vmatpush1.bf16.msra.mxu1 %v2179_v32 }
 0xbcc   :  { %1877 = vmatprep.subr.bf16.mxu1 %v2183_v33 }
 0xbcd   :  { %1855 = vmatpush1.bf16.msra.mxu0 %v2187_v37 }
 0xbce   :  { %1880 = vmatprep.subr.bf16.mxu0 %v2063_v59 }
 0xbcf   :  { %1879 = vmatpush1.bf16.msra.mxu1 %v2187_v37 }
 0xc8c   :  { %v1137_v17 = vpop.f32.mrb[6].mxu1 }
 0xc8d   :  { %v1139_v1 = vpop.f32.mrb[7].mxu1  ;;  %v1142_v5 = vadd.f32 %v1137_v17, %v2208_v43  ;;  %v1541_v17 = vld [vmem:[%s2401_s4 + $0x28] sm:$0xff] }
 0xc8e   :  { %v1143_v2 = vadd.f32 %v1139_v1, %v2210_v48  ;;  %v1887_v1 = vpack.c.bf16 %v1541_v17, %v1540_v63 }
 0xc8f   :  { %v1144_v6 = vmul.f32 0.5, %v1142_v5 }
 0xc90   :  { %1959 = vtanh.f32 %v1143_v2  ;;  %v1145_v15 = vmul.f32 0.5, %v1143_v2  ;;  %v1542_v2 = vld [vmem:[%s2401_s4 + $0x30] sm:$0xff] }
 0xc91   :  { %1961 = vtanh.f32 %v1144_v6 }
 0xc9a   :  { %v1960_v3 = vpop.eup %1959 }
 0xc9b   :  { %1155 = vrot.lane.b32.xlu0 %v1960_v3, %s2062_s16  ;;  %v1962_v18 = vpop.eup %1961  ;;  %v1543_v3 = vld [vmem:[%s2401_s4 + $0x38] sm:$0xff] }
 0xc9c   :  { %v1148_v7 = vmul.f32 0.5, %v1962_v18  ;;  %v1890_v5 = vpack.c.bf16 %v1543_v3, %v1542_v2 }
 0xc9e   :  { %v1150_v10 = vadd.f32 0.5, %v1148_v7 }
 0xca0   :  { %v1153_v30 = vmul.f32 %v1150_v10, %v985_v56 }
 0xd0d   :  { %v1156_v26 = vpop.permute.xlu0 %1155 }
 0xd0e   :  { %v1158_v11 = vmul.f32 %v1156_v26, %v1150_v10 }
 0xd10   :  { %1160 = vrot.lane.b32.xlu1 %v1158_v11, %s2062_s16 }
 0xd82   :  { %v1161_v12 = vpop.permute.xlu1 %1160 }
 0xd83   :  { %v1163_v13 = vadd.f32 %v1161_v12, %v1153_v30 }
 0xd85   :  { %1963 = vtanh.f32 %v1163_v13 }
 0xd86   :  { %1965 = vtanh.f32 %v1145_v15 }
 0xd8f   :  { %v1964_v14 = vpop.eup %1963 }
 0xd90   :  { %1166 = vrot.lane.b32.xlu0 %v1964_v14, %s2062_s16  ;;  %v1966_v19 = vpop.eup %1965 }
 0xd91   :  { %v1149_v20 = vmul.f32 0.5, %v1966_v19 }
 0xd93   :  { %v1151_v21 = vadd.f32 0.5, %v1149_v20 }
 0xe02   :  { %v1167_v23 = vpop.permute.xlu0 %1166 }
 0xe03   :  { %v1169_v24 = vmul.f32 %v1167_v23, %v1151_v21 }
 0xe05   :  { %1655 = vmatmul.mubr.msk.f32.vlgmr.msra.gmra.mrb[6].mxu0 %vm162_vm2, %v1169_v24 }
 0xe06   :  { %1685 = vmatprep.mubr.msk.f32.mxu0 %vm2064_vm3, %v2061_v0  ;;  %v1658_v0 = vld [vmem:[%s2402_s5] ss:$0 sm:$0xff] }
 0xed8   :  { %v1315_v25 = vpop.f32.mrb[6].mxu0 }
 0xed9   :  { %v1317_v27 = vpop.f32.mrb[7].mxu0  ;;  %v1320_v31 = vadd.f32 %v1315_v25, %v2208_v43 }
 0xeda   :  { %v1321_v28 = vadd.f32 %v1317_v27, %v2210_v48 }
 0xedb   :  { %v1322_v34 = vmul.f32 0.5, %v1320_v31 }
 0xedc   :  { %1967 = vtanh.f32 %v1321_v28  ;;  %v1323_v8 = vmul.f32 0.5, %v1321_v28 }
 0xedd   :  { %1969 = vtanh.f32 %v1322_v34 }
 0xee6   :  { %v1968_v29 = vpop.eup %1967 }
 0xee7   :  { %1333 = vrot.lane.b32.xlu1 %v1968_v29, %s2062_s16  ;;  %v1970_v35 = vpop.eup %1969 }
 0xee8   :  { %v1326_v36 = vmul.f32 0.5, %v1970_v35 }
 0xeea   :  { %v1328_v38 = vadd.f32 0.5, %v1326_v36 }
 0xeec   :  { %v1331_v42 = vmul.f32 %v1328_v38, %v1163_v13 }
 0xf59   :  { %v1334_v39 = vpop.permute.xlu1 %1333 }
 0xf5a   :  { %v1336_v40 = vmul.f32 %v1334_v39, %v1328_v38 }
 0xf5c   :  { %1338 = vrot.lane.b32.xlu0 %v1336_v40, %s2062_s16 }
 0xfce   :  { %v1339_v44 = vpop.permute.xlu0 %1338 }
 0xfcf   :  { %v1341_v45 = vadd.f32 %v1339_v44, %v1331_v42 }
 0xfd1   :  { %1971 = vtanh.f32 %v1341_v45 }
 0xfd2   :  { %1973 = vtanh.f32 %v1323_v8 }
 0xfdb   :  { %v1972_v46 = vpop.eup %1971 }
 0xfdc   :  { %1344 = vrot.lane.b32.xlu1 %v1972_v46, %s2062_s16  ;;  %v1974_v9 = vpop.eup %1973 }
 0xfdd   :  { %v1327_v47 = vmul.f32 0.5, %v1974_v9 }
 0xfdf   :  { %v1329_v16 = vadd.f32 0.5, %v1327_v47 }
0x104e   :  { %v1345_v49 = vpop.permute.xlu1 %1344 }
0x104f   :  { %v1347_v22 = vmul.f32 %v1345_v49, %v1329_v16 }
0x1051   :  { %1657 = vmatmul.mubr.msk.f32.vlgmr.msra.gmra.mrb[8].mxu1 %vm162_vm2, %v1347_v22 }
0x1124   :  { %v1493_v32 = vpop.f32.mrb[8].mxu1 }
0x1125   :  { %v1495_v33 = vpop.f32.mrb[9].mxu1  ;;  %v1498_v51 = vadd.f32 %v1493_v32, %v2208_v43 }
0x1126   :  { %v1499_v37 = vadd.f32 %v1495_v33, %v2210_v48  ;;  %v1537_v48 = vld [vmem:[%s2401_s4 + $0x8] sm:$0xff] }
0x1127   :  { %v1500_v52 = vmul.f32 0.5, %v1498_v51  ;;  %v1881_v43 = vpack.c.bf16 %v1537_v48, %v1536_v58 }
0x1128   :  { %1975 = vtanh.f32 %v1499_v37  ;;  %v1501_v26 = vmul.f32 0.5, %v1499_v37 }
0x1129   :  { %1977 = vtanh.f32 %v1500_v52  ;;  %1882 = vmatpush3.bf16.msra.mxu0 %v1881_v43 }
0x112a   :  { %1883 = vmatprep.subr.bf16.mxu0 %v2063_v59 }
0x112d   :  { %1885 = vmatpush3.bf16.msra.mxu0 %v1884_v62 }
0x112e   :  { %1886 = vmatprep.subr.bf16.mxu0 %v2063_v59 }
0x1131   :  { %1888 = vmatpush3.bf16.msra.mxu0 %v1887_v1 }
0x1132   :  { %v1976_v50 = vpop.eup %1975  ;;  %1889 = vmatprep.subr.bf16.mxu0 %v2063_v59 }
0x1133   :  { %1511 = vrot.lane.b32.xlu0 %v1976_v50, %s2062_s16  ;;  %v1978_v53 = vpop.eup %1977 }
0x1134   :  { %v1504_v54 = vmul.f32 0.5, %v1978_v53 }
0x1135   :  { %1891 = vmatpush3.bf16.msra.mxu0 %v1890_v5 }
0x1136   :  { %v1506_v55 = vadd.f32 0.5, %v1504_v54 }
0x1138   :  { %v1509_v6 = vmul.f32 %v1506_v55, %v1341_v45 }
0x11a5   :  { %v1512_v56 = vpop.permute.xlu0 %1511 }
0x11a6   :  { %v1514_v57 = vmul.f32 %v1512_v56, %v1506_v55 }
0x11a8   :  { %1516 = vrot.lane.b32.xlu1 %v1514_v57, %s2062_s16 }
0x121a   :  { %v1517_v18 = vpop.permute.xlu1 %1516 }
0x121b   :  { %v1519_v7 = vadd.f32 %v1517_v18, %v1509_v6 }
0x121d   :  { %1979 = vtanh.f32 %v1519_v7  ;;  %1529 = vrot.lane.b32.xlu1 %v1519_v7, %s2062_s16 }
0x121e   :  { %1981 = vtanh.f32 %v1501_v26 }
0x1227   :  { %v1980_v10 = vpop.eup %1979 }
0x1228   :  { %1522 = vrot.lane.b32.xlu0 %v1980_v10, %s2062_s16  ;;  %v1982_v4 = vpop.eup %1981 }
0x1229   :  { %v1505_v30 = vmul.f32 0.5, %v1982_v4 }
0x122b   :  { %v1507_v12 = vadd.f32 0.5, %v1505_v30 }
0x128f   :  { %v1530_v11 = vpop.permute.xlu1 %1529 }
0x1290   :  { %1532 = vst.msk [vmem:[#allocation3] sm:$0x3] %vm56_vm0, %v1530_v11 }
0x129a   :  { %v1523_v13 = vpop.permute.xlu0 %1522 }
0x129b   :  { %v1525_v14 = vmul.f32 %v1523_v13, %v1507_v12 }
0x129d   :  { %1527 = vst.msk [vmem:[#allocation2] sm:$0x3] %vm56_vm0, %v1525_v14  ;;  %1686 = vmatmul.mubr.msk.f32.vlgmr.msra.gmra.mrb[8].mxu0 %vm162_vm2, %v1525_v14 }
0x1370   :  { %v1620_v15 = vpop.f32.mrb[8].mxu0 }
0x1371   :  { %v1621_v19 = vadd.f32 %v1658_v0, %v1620_v15  ;;  %v1687_v20 = vpop.f32.mrb[9].mxu0 }
0x1373   :  { %1625 = vst.msk [vmem:[#allocation9] sm:$0x3] %vm1624_vm4, %v1621_v19 }
0x1374   :  { %2038 = shalt.err (!%p2035_p6)
}
0x1375   :  { %s2039_s12 = scalar_lea.hbm %s2403_s6, 32 }
0x1376   :  { %p2040_p7 = scmp.ne.s32.totalorder %s2403_s6, %s2039_s12  ;;  %p2043_p8 = scmp.lt.u32.totalorder %s2039_s12, %s2403_s6 }
0x1378   :  { %p2045_p9 = pnand %p2043_p8, %p2040_p7 }
0x137a   :  { %2048 = shalt.err (!%p2045_p9)
}
0x137b   :  { %1635 = dma.vmem_to_hbm [thread:$0]  %s1633_s8, 32, %s2403_s6, [#allocation6]  }
0x137c   :  { %2053 = dma.done.wait [#allocation6], 32  }
0x137d   :  { %2054 = vsyncadd [#allocation6], 4294967264 }
0x137e   :  { %1639 = vsyncpa [#allocation5], 1 }
0x137f   :  { %1640 = vsyncpa [#allocation8], 1 }
0x1380   :  { %1641 = vsyncpa [#allocation6], 1 }

</bundles_post_ra>
